<compile_context>
chip_gen: v6e
topology: v6e:2x2x1
jax: 0.10.0
libtpu: 0.0.40
codegen_flags: <defaults>
</compile_context>

<pallas_src>
import jax
import jax.numpy as jnp
from jax.experimental import pallas as pl
from jax.experimental.pallas import tpu as pltpu


# --------------------------------------------------------------------------
# Model hyper-parameters (small, consistent with the module's __init__)
# --------------------------------------------------------------------------
BATCH            = 8
NMOMENTS_LAST    = 6            # nmoments[-1]  -> input dim of list_fc[0]
FC_METAFEATURES  = [32, 16]     # parameters['fc_metafeatures']
NB_OUTPUT_CLASS  = 5            # parameters['nb_output_class']
FINAL_FC_OUT_DIM = NB_OUTPUT_CLASS * 2   # parameters['final_fc_output_dim']


# --------------------------------------------------------------------------
# Fused forward: fc_metafeatures stack + fc1 + pairwise log_softmax
# --------------------------------------------------------------------------
def net_forward(z_moments, w1, b1, w2, b2, wf, bf):
    """Runs the fused Net forward (downstream of the EB stages) on TPU."""
    B, d0 = z_moments.shape
    d1 = w1.shape[1]          # 32
    d2 = w2.shape[1]          # 16
    df = wf.shape[1]          # 10
    C  = df // 2              # 5

    f32   = jnp.float32
    K1    = 8                 # padded K of first matmul (>= d0 + 1 ones lane)
    W1    = d1 + 8            # layer-1 output width, 8-aligned: [h1 | 1 | 0*7]
    ONE   = d1                # column that holds the constant 1.0 after relu
    wc    = d2 + 2 * C        # useful width of fused [w2 | w2@wf] block (26)
    out_w = d1 + d2 + 2 * C   # packed output slab width (58)

    # --- wrapper-side precompute (tiny; runs once in XLA) -------------------
    # permute fc1 columns to [pair-element-0 | pair-element-1] halves
    perm = jnp.concatenate([jnp.arange(0, df, 2), jnp.arange(1, df, 2)])
    wf_p = wf[:, perm]
    bf_p = bf[:, perm]
    # fold fc1 into the second fc layer:
    #   logits = h1 @ (w2 @ wf_p) + (b2 @ wf_p + bf_p)
    w2f = (w2 @ wf_p).astype(f32)               # (d1, 2C)
    b2f = (b2 @ wf_p + bf_p).astype(f32)        # (1, 2C)

    # Layer-1 weight block (K1, W1): rows 0..d0-1 = w1, row d0 = b1 (picked up
    # by the ones lane of the padded input); column ONE is 0 except row d0 = 1
    # so relu() yields a constant-1 lane that feeds layer 2's bias row.
    w1_blk = jnp.zeros((K1, W1), f32)
    w1_blk = w1_blk.at[:d0, :d1].set(w1.astype(f32))
    w1_blk = w1_blk.at[d0, :d1].set(b1[0].astype(f32))
    w1_blk = w1_blk.at[d0, ONE].set(1.0)

    # Layer-2 (+ folded fc1) weight block (W1, W1): rows 0..d1-1 = [w2 | w2f],
    # row ONE = [b2 | b2f]; remaining rows multiply the zero lanes of h1_aug.
    w2_blk = jnp.zeros((W1, W1), f32)
    w2_blk = w2_blk.at[:d1, :d2].set(w2.astype(f32))
    w2_blk = w2_blk.at[:d1, d2:wc].set(w2f)
    w2_blk = w2_blk.at[ONE, :d2].set(b2[0].astype(f32))
    w2_blk = w2_blk.at[ONE, d2:wc].set(b2f[0])

    # single packed weight slab: rows [0, 8) layer-1 block, rows [8, 48) layer-2
    w_slab = jnp.concatenate([w1_blk, w2_blk], axis=0)      # (K1 + W1, W1)

    # padded moment vector: [z | 1 | 0]  (K dim = one sublane group of 8)
    z_pad = jnp.zeros((B, K1), f32).at[:, :d0].set(z_moments.astype(f32))
    z_pad = z_pad.at[:, d0].set(1.0)

    def kernel(z_ref, w_ref, o_ref):
        # layer 1, bias folded into the MXU: h1_aug = relu(z_pad @ W1_blk)
        h1_aug = jnp.maximum(
            jnp.dot(z_ref[...], w_ref[0:K1, :],
                    preferred_element_type=jnp.float32), 0.0)

        # fused layer 2 + fc1 (bias also inside the MXU), single dependent matmul
        out = jnp.dot(h1_aug, w_ref[K1:K1 + W1, :],
                      preferred_element_type=jnp.float32)

        z_out = out[:, 0:d2]                    # h1 @ w2 + b2
        la    = out[:, d2:d2 + C]               # logits, pair element 0
        lb    = out[:, d2 + C:d2 + 2 * C]       # logits, pair element 1

        # lane-contiguous pairwise log_softmax (pure elementwise, f32)
        m   = jnp.maximum(la, lb)
        lse = m + jnp.log(jnp.exp(la - m) + jnp.exp(lb - m))

        # packed output slab: [ h1 | z_out | logp_a | logp_b ]
        o_ref[:, 0:d1]                          = h1_aug[:, 0:d1]
        o_ref[:, d1:d1 + d2]                    = z_out
        o_ref[:, d1 + d2:d1 + d2 + C]           = la - lse
        o_ref[:, d1 + d2 + C:d1 + d2 + 2 * C]   = lb - lse

    full = lambda shape: pl.BlockSpec(shape, lambda: tuple(0 for _ in shape))

    out = pl.pallas_call(
        kernel,
        out_shape=jax.ShapeDtypeStruct((B, out_w), f32),
        grid=(),
        in_specs=[full((B, K1)), full(w_slab.shape)],
        out_specs=full((B, out_w)),
        # TODO(synk): for large batches on v7x, add a batch grid axis with
        # dimension_semantics=("parallel",) so both TensorCores get work.
        compiler_params=pltpu.CompilerParams(),
    )(z_pad, w_slab)

    # unpack + rebuild the (B, C, 2) pairing outside the kernel (plain JAX)
    h1    = out[:, :d1]
    z_out = out[:, d1:d1 + d2]
    lp_a  = out[:, d1 + d2:d1 + d2 + C]
    lp_b  = out[:, d1 + d2 + C:]
    logp  = jnp.stack([lp_a, lp_b], axis=-1)    # matches torch z.view(B, C, 2)
    return logp, z_out, h1


# --------------------------------------------------------------------------
# Deterministic parameter init (emulates nn.Linear default uniform init)
# --------------------------------------------------------------------------
def init_linear(key, d_in, d_out):
    kw, kb = jax.random.split(key)
    bound = 1.0 / jnp.sqrt(jnp.float32(d_in))
    # Stored directly in (in, out) layout == torch weight (out, in) transposed.
    w = jax.random.uniform(kw, (d_in, d_out), jnp.float32, -bound, bound)
    b = jax.random.uniform(kb, (1, d_out), jnp.float32, -bound, bound)
    return w, b


if __name__ == "__main__":
    key = jax.random.PRNGKey(0)
    k_z, k1, k2, kf = jax.random.split(key, 4)

    # Moment vector produced by the (undefined) EB stages of the Extractor.
    # TODO(synk): replace with real EB / EB_variable compute once defined.
    z_moments = jax.random.normal(k_z, (BATCH, NMOMENTS_LAST), jnp.float32)

    # Extractor.list_fc: Linear(nmoments[-1] -> 32), Linear(32 -> 16)
    w1, b1 = init_linear(k1, NMOMENTS_LAST, FC_METAFEATURES[0])
    w2, b2 = init_linear(k2, FC_METAFEATURES[0], FC_METAFEATURES[1])
    # Net.fc1: Linear(fc_metafeatures[-1] -> final_fc_output_dim)
    wf, bf = init_linear(kf, FC_METAFEATURES[1], FINAL_FC_OUT_DIM)

    logp, z_out, z1 = net_forward(z_moments, w1, b1, w2, b2, wf, bf)
    jax.block_until_ready((logp, z_out, z1))

    # Reference check in plain JAX (unfused, same math as the torch module).
    h1_ref = jnp.maximum(z_moments @ w1 + b1, 0.0)
    h2_ref = h1_ref @ w2 + b2
    logits_ref = (h2_ref @ wf + bf).reshape(BATCH, NB_OUTPUT_CLASS, 2)
    logp_ref = jax.nn.log_softmax(logits_ref, axis=2)

    assert logp.shape == (BATCH, NB_OUTPUT_CLASS, 2)
    assert jnp.allclose(logp, logp_ref, atol=1e-4)
    assert jnp.allclose(z_out, h2_ref, atol=1e-4)
    assert jnp.allclose(z1, h1_ref, atol=1e-4)

    print("KERNEL_OK")
</pallas_src>

<mosaic_0001>
module attributes {stable_mosaic.version = 11 : i64} {
  func.func @kernel(%arg0: memref<8x8xf32, #tpu.memory_space<vmem>>, %arg1: memref<48x40xf32, #tpu.memory_space<vmem>>, %arg2: memref<8x58xf32, #tpu.memory_space<vmem>>) attributes {dimension_semantics = [], scalar_prefetch = 0 : i64, scratch_operands = 0 : i64, tpu.core_type = #tpu.core_type<tc>} {
    %c0 = arith.constant 0 : index
    %c0_0 = arith.constant 0 : index
    %0 = vector.load %arg0[%c0, %c0_0] : memref<8x8xf32, #tpu.memory_space<vmem>>, vector<8x8xf32>
    %c0_1 = arith.constant 0 : index
    %c0_2 = arith.constant 0 : index
    %1 = vector.load %arg1[%c0_1, %c0_2] : memref<48x40xf32, #tpu.memory_space<vmem>>, vector<8x40xf32>
    %cst = arith.constant dense<0.000000e+00> : vector<8x40xf32>
    %2 = tpu.matmul %0, %1, %cst {dimension_numbers = #tpu.dot_dimension_numbers<[1], [0], [0], [1], [0, 0, 1, 1], [], []>} : vector<8x8xf32>, vector<8x40xf32>, vector<8x40xf32> -> vector<8x40xf32>
    %cst_3 = arith.constant 0.000000e+00 : f32
    %3 = vector.broadcast %cst_3 : f32 to vector<8x40xf32>
    %4 = arith.maximumf %2, %3 : vector<8x40xf32>
    %c8 = arith.constant 8 : index
    %c0_4 = arith.constant 0 : index
    %5 = vector.load %arg1[%c8, %c0_4] : memref<48x40xf32, #tpu.memory_space<vmem>>, vector<40x40xf32>
    %cst_5 = arith.constant dense<0.000000e+00> : vector<8x40xf32>
    %6 = tpu.matmul %4, %5, %cst_5 {dimension_numbers = #tpu.dot_dimension_numbers<[1], [0], [0], [1], [0, 0, 1, 1], [], []>} : vector<8x40xf32>, vector<40x40xf32>, vector<8x40xf32> -> vector<8x40xf32>
    %7 = vector.extract_strided_slice %6 {offsets = [0, 0], sizes = [8, 16], strides = [1, 1]} : vector<8x40xf32> to vector<8x16xf32>
    %8 = vector.extract_strided_slice %6 {offsets = [0, 16], sizes = [8, 5], strides = [1, 1]} : vector<8x40xf32> to vector<8x5xf32>
    %9 = vector.extract_strided_slice %6 {offsets = [0, 21], sizes = [8, 5], strides = [1, 1]} : vector<8x40xf32> to vector<8x5xf32>
    %10 = arith.maximumf %8, %9 : vector<8x5xf32>
    %11 = arith.subf %8, %10 : vector<8x5xf32>
    %12 = math.exp %11 : vector<8x5xf32>
    %13 = arith.subf %9, %10 : vector<8x5xf32>
    %14 = math.exp %13 : vector<8x5xf32>
    %15 = arith.addf %12, %14 : vector<8x5xf32>
    %16 = math.log %15 : vector<8x5xf32>
    %17 = arith.addf %10, %16 : vector<8x5xf32>
    %18 = vector.extract_strided_slice %4 {offsets = [0, 0], sizes = [8, 32], strides = [1, 1]} : vector<8x40xf32> to vector<8x32xf32>
    %c0_6 = arith.constant 0 : index
    %c0_7 = arith.constant 0 : index
    %19 = vector.load %arg2[%c0_6, %c0_7] : memref<8x58xf32, #tpu.memory_space<vmem>>, vector<8x32xf32>
    tpu.vector_store %arg2[%c0_6, %c0_7], %18 {strides = array<i32>} : memref<8x58xf32, #tpu.memory_space<vmem>>, vector<8x32xf32>,
    %c0_8 = arith.constant 0 : index
    %c32 = arith.constant 32 : index
    %20 = vector.load %arg2[%c0_8, %c32] : memref<8x58xf32, #tpu.memory_space<vmem>>, vector<8x16xf32>
    tpu.vector_store %arg2[%c0_8, %c32], %7 {strides = array<i32>} : memref<8x58xf32, #tpu.memory_space<vmem>>, vector<8x16xf32>,
    %21 = arith.subf %8, %17 : vector<8x5xf32>
    %c0_9 = arith.constant 0 : index
    %c48 = arith.constant 48 : index
    %22 = vector.load %arg2[%c0_9, %c48] : memref<8x58xf32, #tpu.memory_space<vmem>>, vector<8x5xf32>
    tpu.vector_store %arg2[%c0_9, %c48], %21 {strides = array<i32>} : memref<8x58xf32, #tpu.memory_space<vmem>>, vector<8x5xf32>,
    %23 = arith.subf %9, %17 : vector<8x5xf32>
    %c0_10 = arith.constant 0 : index
    %c53 = arith.constant 53 : index
    %24 = vector.load %arg2[%c0_10, %c53] : memref<8x58xf32, #tpu.memory_space<vmem>>, vector<8x5xf32>
    tpu.vector_store %arg2[%c0_10, %c53], %23 {strides = array<i32>} : memref<8x58xf32, #tpu.memory_space<vmem>>, vector<8x5xf32>,
    return
  }
}

</mosaic_0001>

<bundles_post_ra>
// kernel: tpu_custom_call.1
= control target key start
LH: loop header
LB: loop body
LE: loop exit
PB: predicated region body
PF: predicated region fallthrough
CT: control target
= control target key end

     0   :  { %vm14_vm0 = vcmask 64512   ;;  %v292_v3 = vmov 0.0   ;;  %vm293_vm1 = vmmov 0   ;;  %s337_s0 = inlined_call_operand.vmem [shape: f32[8,8], index: 0, kind: input, shape index: {}]   ;;  %s338_s1 = inlined_call_operand.vmem [shape: f32[48,40], index: 1, kind: input, shape index: {}]   ;;  %s339_s2 = inlined_call_operand.hbm [shape: f32[8,58], index: 2, kind: output, shape index: {}]  }
   0x1   :  { %v13_v0 = vld [vmem:[%s338_s1] sm:$0xff]  ;;  %v93_v2 = vld [vmem:[%s338_s1 + $0x28] sm:$0xff]  ;;  %240 = vmatprep.subr.mxu0 %v292_v3  ;;  %242 = vmatprep.mubr.msk.f32.mxu0 %vm293_vm1, %v292_v3 }
   0x2   :  { %v12_v1 = vld [vmem:[%s337_s0] sm:$0xff] }
   0x3   :  { %7 = vsyncpa [#allocation3], 0  ;;  %241 = vmatpush3.msra.mxu0 %v13_v0  ;;  %245 = vmatprep.subr.mxu1 %v292_v3  ;;  %v92_v4 = vld [vmem:[%s338_s1 + $0x20] sm:$0xff]  ;;  %v91_v5 = vld [vmem:[%s338_s1 + $0x18] sm:$0xff]  ;;  %vm191_vm2 = vcmask 261120   ;;  %vm94_vm3 = vcmask 326656  }
   0x4   :  { %243 = vmatmul.mubr.msk.f32.vlgmr.msra.gmra.mxu0 %vm14_vm0, %v12_v1  ;;  %246 = vmatpush3.msra.mxu1 %v93_v2  ;;  %v90_v6 = vld [vmem:[%s338_s1 + $0x10] sm:$0xff]  ;;  %v89_v7 = vld [vmem:[%s338_s1 + $0x8] sm:$0xff]  ;;  %s294_s22 = smov 123   ;;  %s295_s23 = smov 5   ;;  %vm196_vm4 = vcmask 392448   ;;  %vm203_vm5 = vcmask 433536  }
   0x5   :  { %247 = vmatprep.subr.mxu1 %v292_v3  ;;  %255 = vmatprep.mubr.msk.f32.mxu1 %vm293_vm1, %v292_v3  ;;  %s296_s24 = smov 32   ;;  %s297_s1 = smov [#allocation2]   ;;  %vm214_vm6 = vcmask 474536  }
   0x6   :  { %248 = vmatpush3.msra.mxu1 %v92_v4  ;;  %s222_s25 = sshll.u32 %s297_s1, 4  ;;  %s223_s25 = int_to_ptr.vmem [resolvable:$true] %s222_s25 }
   0x7   :  { %249 = vmatprep.subr.mxu1 %v292_v3  ;;  %s270_s26 = scalar_lea.vmem %s223_s25, 128  ;;  %p275_p1 = scmp.lt.s32.totalorder %s223_s25, %s223_s25 }
   0x8   :  { %250 = vmatpush3.msra.mxu1 %v91_v5  ;;  %p271_p0 = scmp.ne.s32.totalorder %s223_s25, %s270_s26  ;;  %p276_p2 = scmp.lt.s32.totalorder %s270_s26, %s270_s26 }
   0x9   :  { %251 = vmatprep.subr.mxu1 %v292_v3 }
   0xa   :  { %252 = vmatpush3.msra.mxu1 %v90_v6  ;;  %p277_p3 = por %p276_p2, %p275_p1 }
   0xb   :  { %253 = vmatprep.subr.mxu1 %v292_v3 }
   0xc   :  { %254 = vmatpush3.msra.mxu1 %v89_v7  ;;  %p278_p4 = pnand %p277_p3, %p271_p0 }
  0xc4   :  { %v84_v8 = vpop.f32.mrf.mxu0 }
  0xc5   :  { %v88_v9 = vmax.f32 %v84_v8, 0.0 }
  0xc6   :  { %v244_v10 = vpop.f32.mrf.mxu0 }
  0xc7   :  { %192 = vst.msk [vmem:[#allocation2] sm:$0xff] %vm191_vm2, %v88_v9  ;;  %256 = vmatmul.mubr.msk.f32.vlgmr.msra.gmra.mxu1 %vm94_vm3, %v88_v9 }
 0x187   :  { %v164_v11 = vpop.f32.mrf.mxu1 }
 0x188   :  { %169 = vrot.lane.b32.xlu0 %v164_v11, %s294_s22 }
 0x189   :  { %v257_v12 = vpop.f32.mrf.mxu1 }
 0x1fa   :  { %v170_v13 = vpop.permute.xlu0 %169 }
 0x1fb   :  { %v172_v14 = vmax.f32 %v164_v11, %v170_v13 }
 0x1fd   :  { %177 = vrot.lane.b32.xlu0 %v172_v14, %s295_s23  ;;  %v173_v20 = vsub.f32 %v164_v11, %v172_v14 }
 0x1ff   :  { %v174_v21 = vmul.f32 1.442695, %v173_v20 }
 0x201   :  { %193 = vrot.lane.b32.xlu0 %v164_v11, %s296_s24 }
 0x26f   :  { %v178_v15 = vpop.permute.xlu0 %177 }
 0x270   :  { %v180_v16 = vsub.f32 %v164_v11, %v178_v15 }
 0x272   :  { %v181_v17 = vmul.f32 1.442695, %v180_v16 }
 0x273   :  { %v194_v18 = vpop.permute.xlu0 %193 }
 0x274   :  { %264 = vpow2.f32 %v181_v17  ;;  %197 = vst.msk [vmem:[#allocation2] sm:$0xff] %vm196_vm4, %v194_v18 }
 0x275   :  { %266 = vpow2.f32 %v174_v21 }
 0x281   :  { %v265_v19 = vpop.eup %264 }
 0x282   :  { %184 = vrot.lane.b32.xlu1 %v265_v19, %s294_s22  ;;  %v267_v22 = vpop.eup %266 }
 0x2f4   :  { %v185_v23 = vpop.permute.xlu1 %184 }
 0x2f5   :  { %v187_v24 = vadd.f32 %v267_v22, %v185_v23 }
 0x2f7   :  { %268 = vlog2.f32 %v187_v24 }
 0x304   :  { %v269_v25 = vpop.eup %268 }
 0x305   :  { %v189_v26 = vmul.f32 0.6931472, %v269_v25 }
 0x307   :  { %v190_v27 = vadd.f32 %v189_v26, %v172_v14 }
 0x309   :  { %206 = vrot.lane.b32.xlu1 %v190_v27, %s295_s23  ;;  %v198_v28 = vsub.f32 %v164_v11, %v190_v27 }
 0x30d   :  { %200 = vrot.lane.b32.xlu1 %v198_v28, %s296_s24 }
 0x37b   :  { %v207_v29 = vpop.permute.xlu1 %206 }
 0x37c   :  { %v209_v30 = vsub.f32 %v164_v11, %v207_v29 }
 0x37e   :  { %211 = vrot.lane.b32.xlu0 %v209_v30, %s296_s24 }
 0x37f   :  { %v201_v31 = vpop.permute.xlu1 %200 }
 0x380   :  { %204 = vst.msk [vmem:[#allocation2] sm:$0xff] %vm203_vm5, %v201_v31 }
 0x3f0   :  { %v212_v32 = vpop.permute.xlu0 %211 }
 0x3f1   :  { %215 = vst.msk [vmem:[#allocation2] sm:$0xff] %vm214_vm6, %v212_v32 }
 0x3f2   :  { %281 = shalt.err (!%p278_p4)
}
 0x3f3   :  { %225 = dma.vmem_to_hbm [thread:$0]  %s223_s25, 128, %s339_s2, [#allocation3]  }
 0x3f4   :  { %290 = dma.done.wait [#allocation3], 128  }
 0x3f5   :  { %291 = vsyncadd [#allocation3], 4294967168 }
 0x3f6   :  { %229 = vsyncpa [#allocation3], 1 }

</bundles_post_ra>
